<compile_context>
chip_gen: v5e
topology: v5e:2x2
jax: 0.10.0
libtpu: 0.0.40
codegen_flags: <defaults>
</compile_context>

<pallas_src>
import math

import jax
import jax.numpy as jnp
from jax.experimental import pallas as pl
from jax.experimental.pallas import tpu as pltpu


def _attn_kernel(xq_ref, xkv_ref, wq_ref, bq_ref, wk_ref, bk_ref, wv_ref, bv_ref,
                 o_ref, q_sc, m_sc, l_sc, acc_sc):
    """One (batch-block, kv-block) grid step of online-softmax attention."""
    kv = pl.program_id(1)
    Bb, Lq, E = xq_ref.shape
    _, Lkb, _ = xkv_ref.shape
    dkp = wq_ref.shape[1]
    dvp = wv_ref.shape[1]

    # --- kv == 0: project Q once per batch block and reset the accumulators. ---
    @pl.when(kv == 0)
    def _():
        xq = xq_ref[...].reshape(Bb * Lq, E)           # flatten batch into MXU M-dim
        q = jnp.dot(xq, wq_ref[...], preferred_element_type=jnp.float32) + bq_ref[...]
        q_sc[...] = q.reshape(Bb, Lq, dkp).astype(jnp.bfloat16)
        m_sc[...] = jnp.full(m_sc.shape, -jnp.inf, dtype=m_sc.dtype)
        l_sc[...] = jnp.zeros(l_sc.shape, dtype=l_sc.dtype)
        acc_sc[...] = jnp.zeros(acc_sc.shape, dtype=acc_sc.dtype)

    # --- K / V projections for this kv block (bf16 MXU, f32 accumulation). ---
    # TODO(synk): on v7x the projection weights could be fp8 (scale folded into
    # the epilogue) for 2x MXU throughput; kept bf16 for cross-generation safety.
    xkv = xkv_ref[...].reshape(Bb * Lkb, E)
    k = jnp.dot(xkv, wk_ref[...], preferred_element_type=jnp.float32) + bk_ref[...]
    v = jnp.dot(xkv, wv_ref[...], preferred_element_type=jnp.float32) + bv_ref[...]
    k = k.reshape(Bb, Lkb, dkp).astype(jnp.bfloat16)
    v = v.reshape(Bb, Lkb, dvp).astype(jnp.bfloat16)

    # --- scores = (q / sqrt(dk)) @ k^T  (scale pre-folded into Wq/bq). ---
    s = jnp.einsum("bqd,bkd->bqk", q_sc[...], k,
                   preferred_element_type=jnp.float32)

    # TODO(synk): optional boolean `mask` (masked_fill with -1e9) would be applied
    # to `s` here; the reference forward defaults to mask=None.

    # --- online softmax update (all f32). ---
    m_prev = m_sc[...]
    m_new = jnp.maximum(m_prev, jnp.max(s, axis=-1, keepdims=True))
    alpha = jnp.exp(m_prev - m_new)
    p = jnp.exp(s - m_new)
    l_sc[...] = alpha * l_sc[...] + jnp.sum(p, axis=-1, keepdims=True)
    acc_sc[...] = alpha * acc_sc[...] + jnp.einsum(
        "bqk,bkd->bqd", p.astype(jnp.bfloat16), v,
        preferred_element_type=jnp.float32)
    m_sc[...] = m_new

    # --- last kv block: normalize and emit the lane-dense output block. ---
    @pl.when(kv == pl.num_programs(1) - 1)
    def _():
        o_ref[...] = (acc_sc[...] / l_sc[...]).astype(o_ref.dtype)


def _round_up(x, m):
    return ((x + m - 1) // m) * m


def _vmem_capacity_bytes():
    try:
        return int(pltpu.get_tpu_info().vmem_capacity_bytes)
    except Exception:
        return 64 * 1024 * 1024  # conservative fallback: v7x per-TensorCore VMEM


def _batch_block(B, Lq, target_m, cap):
    """Largest divisor of B with block*Lq <= target_m and block <= cap."""
    best = 1
    for d in range(1, B + 1):
        if B % d == 0 and d * Lq <= target_m and d <= cap:
            best = d
    return best


def _kv_block(Lk, target_kv=512):
    """Largest 'nice' divisor of Lk (multiple of 128, else 8) that is <= target_kv."""
    if Lk <= target_kv:
        return Lk
    for mult in (128, 8):
        for d in range(target_kv, 0, -1):
            if Lk % d == 0 and d % mult == 0:
                return d
    # TODO(synk): ragged Lk with no aligned divisor falls back to a single block.
    return Lk


def onehead_atten(x_q, x_k_v, params, mask=None, out_dtype=None):
    """x_q: (B, Lq, E), x_k_v: (B, Lk, E) -> (B, Lq, v_size)."""
    if mask is not None:
        # TODO(synk): optional boolean mask (masked_fill -1e9) not wired into the kernel.
        raise NotImplementedError("mask is not supported by the Pallas kernel yet")

    wq, bq = params["wq"], params["bq"]
    wk, bk = params["wk"], params["bk"]
    wv, bv = params["wv"], params["bv"]

    B, Lq, E = x_q.shape
    _, Lk, _ = x_k_v.shape
    dk = wq.shape[0]
    dv = wv.shape[0]
    scale = 1.0 / math.sqrt(dk)
    out_dtype = x_q.dtype if out_dtype is None else out_dtype

    # Lane-dense padding of both projection widths (padded columns are zero in
    # both q and k, so q.k^T is unchanged; padded v columns give zero outputs).
    dk_pad = _round_up(dk, 128)
    dv_pad = _round_up(dv, 128)

    # Host-side (one-time) weight prep: transpose to (E, out), fold the score
    # scale into Wq/bq, zero-pad to lane-dense widths.
    wqT = jnp.zeros((E, dk_pad), jnp.bfloat16).at[:, :dk].set(
        (wq.T * scale).astype(jnp.bfloat16))
    bq2 = jnp.zeros((1, dk_pad), jnp.float32).at[:, :dk].set(
        bq.astype(jnp.float32) * scale)
    wkT = jnp.zeros((E, dk_pad), jnp.bfloat16).at[:, :dk].set(
        wk.T.astype(jnp.bfloat16))
    bk2 = jnp.zeros((1, dk_pad), jnp.float32).at[:, :dk].set(bk.astype(jnp.float32))
    wvT = jnp.zeros((E, dv_pad), jnp.bfloat16).at[:, :dv].set(
        wv.T.astype(jnp.bfloat16))
    bv2 = jnp.zeros((1, dv_pad), jnp.float32).at[:, :dv].set(bv.astype(jnp.float32))

    xq_bf = x_q.astype(jnp.bfloat16)
    xkv_bf = x_k_v.astype(jnp.bfloat16)

    # Generation-aware tile sizing (v5e/v6e: 128 MiB VMEM, v7x: 64 MiB).
    vmem_cap = _vmem_capacity_bytes()
    target_m = 1024 if vmem_cap >= (96 << 20) else 512
    b_cap = max(1, B // 2) if B >= 2 else 1   # >= 2 parallel steps for v7x megacore
    b_blk = _batch_block(B, Lq, target_m, b_cap)
    lk_blk = _kv_block(Lk)
    grid = (B // b_blk, Lk // lk_blk)

    # Explicit scoped-VMEM budget: leave headroom below physical capacity.
    vmem_limit = min(int(vmem_cap * 0.75), vmem_cap - (8 << 20))

    # Weights/biases: whole arrays resident in VMEM, DMA'd once (no double buffer).
    weight_spec = pl.BlockSpec(memory_space=pltpu.MemorySpace.VMEM)

    out_pad = pl.pallas_call(
        _attn_kernel,
        out_shape=jax.ShapeDtypeStruct((B, Lq, dv_pad), out_dtype),
        grid_spec=pltpu.PrefetchScalarGridSpec(
            num_scalar_prefetch=0,
            grid=grid,
            in_specs=[
                pl.BlockSpec((b_blk, Lq, E), lambda b, kv: (b, 0, 0)),       # x_q
                pl.BlockSpec((b_blk, lk_blk, E), lambda b, kv: (b, kv, 0)),  # x_k_v
                weight_spec,   # Wq^T * scale  (E, dk_pad)
                weight_spec,   # bq * scale    (1, dk_pad)
                weight_spec,   # Wk^T          (E, dk_pad)
                weight_spec,   # bk            (1, dk_pad)
                weight_spec,   # Wv^T          (E, dv_pad)
                weight_spec,   # bv            (1, dv_pad)
            ],
            out_specs=pl.BlockSpec((b_blk, Lq, dv_pad), lambda b, kv: (b, 0, 0)),
            scratch_shapes=[
                pltpu.VMEM((b_blk, Lq, dk_pad), jnp.bfloat16),  # cached Q block
                pltpu.VMEM((b_blk, Lq, 1), jnp.float32),        # running max m
                pltpu.VMEM((b_blk, Lq, 1), jnp.float32),        # running sum l
                pltpu.VMEM((b_blk, Lq, dv_pad), jnp.float32),   # output accumulator
            ],
        ),
        compiler_params=pltpu.CompilerParams(
            dimension_semantics=("parallel", "arbitrary"),
            vmem_limit_bytes=vmem_limit,
        ),
    )(xq_bf, xkv_bf, wqT, bq2, wkT, bk2, wvT, bv2)

    # Consumers that tolerate the padded lane-dense layout can skip this slice.
    return out_pad[..., :dv]


def _reference(x_q, x_k_v, params):
    """Plain-JAX f32 reference mirroring the PyTorch forward."""
    q = x_q @ params["wq"].T + params["bq"]
    k = x_k_v @ params["wk"].T + params["bk"]
    v = x_k_v @ params["wv"].T + params["bv"]
    scores = jnp.einsum("bqd,bkd->bqk", q, k) / math.sqrt(q.shape[-1])
    w = jax.nn.softmax(scores, axis=-1)
    return jnp.einsum("bqk,bkd->bqd", w, v)


def _init_params(key, emd_size, q_k_size, v_size):
    ks = jax.random.split(key, 6)
    bound = 1.0 / math.sqrt(emd_size)
    return {
        "wq": jax.random.uniform(ks[0], (q_k_size, emd_size), jnp.float32,
                                 -bound, bound),
        "bq": jax.random.uniform(ks[1], (q_k_size,), jnp.float32, -bound, bound),
        "wk": jax.random.uniform(ks[2], (q_k_size, emd_size), jnp.float32,
                                 -bound, bound),
        "bk": jax.random.uniform(ks[3], (q_k_size,), jnp.float32, -bound, bound),
        "wv": jax.random.uniform(ks[4], (v_size, emd_size), jnp.float32,
                                 -bound, bound),
        "bv": jax.random.uniform(ks[5], (v_size,), jnp.float32, -bound, bound),
    }


if __name__ == "__main__":
    key = jax.random.PRNGKey(0)
    B, Lq, Lk = 2, 8, 8
    emd_size, q_k_size, v_size = 32, 16, 32

    k_params, k_xq, k_xkv = jax.random.split(key, 3)
    params = _init_params(k_params, emd_size, q_k_size, v_size)
    x_q = jax.random.normal(k_xq, (B, Lq, emd_size), jnp.float32)
    x_k_v = jax.random.normal(k_xkv, (B, Lk, emd_size), jnp.float32)

    out = onehead_atten(x_q, x_k_v, params)
    out = jax.block_until_ready(out)

    ref = _reference(x_q, x_k_v, params)
    assert out.shape == (B, Lq, v_size)
    # bf16 MXU inputs (f32 accumulation) -> slightly looser tolerance than pure f32.
    assert jnp.allclose(out, ref, atol=3e-2, rtol=3e-2), float(
        jnp.max(jnp.abs(out - ref)))

    print("KERNEL_OK")
</pallas_src>

<mosaic_0001>
module attributes {stable_mosaic.version = 11 : i64} {
  func.func @_attn_kernel(%arg0: i32, %arg1: i32, %arg2: memref<1x8x32xbf16, #tpu.memory_space<vmem>>, %arg3: memref<1x8x32xbf16, #tpu.memory_space<vmem>>, %arg4: memref<32x128xbf16, #tpu.memory_space<vmem>>, %arg5: memref<1x128xf32, #tpu.memory_space<vmem>>, %arg6: memref<32x128xbf16, #tpu.memory_space<vmem>>, %arg7: memref<1x128xf32, #tpu.memory_space<vmem>>, %arg8: memref<32x128xbf16, #tpu.memory_space<vmem>>, %arg9: memref<1x128xf32, #tpu.memory_space<vmem>>, %arg10: memref<1x8x128xf32, #tpu.memory_space<vmem>>, %arg11: memref<1x8x128xbf16, #tpu.memory_space<vmem>>, %arg12: memref<1x8x1xf32, #tpu.memory_space<vmem>>, %arg13: memref<1x8x1xf32, #tpu.memory_space<vmem>>, %arg14: memref<1x8x128xf32, #tpu.memory_space<vmem>>) attributes {dimension_semantics = [#tpu.dimension_semantics<parallel>, #tpu.dimension_semantics<arbitrary>], iteration_bounds = array<i64: 2, 1>, scalar_prefetch = 0 : i64, scratch_operands = 4 : i64, tpu.core_type = #tpu.core_type<tc>, window_params = [{transform_indices = @transform_0, window_bounds = array<i64: 1, 8, 32>}, {transform_indices = @transform_1, window_bounds = array<i64: 1, 8, 32>}, {pipeline_mode = #tpu.pipeline_mode<synchronous>, transform_indices = @transform_2, window_bounds = array<i64: 32, 128>}, {pipeline_mode = #tpu.pipeline_mode<synchronous>, transform_indices = @transform_3, window_bounds = array<i64: 1, 128>}, {pipeline_mode = #tpu.pipeline_mode<synchronous>, transform_indices = @transform_4, window_bounds = array<i64: 32, 128>}, {pipeline_mode = #tpu.pipeline_mode<synchronous>, transform_indices = @transform_5, window_bounds = array<i64: 1, 128>}, {pipeline_mode = #tpu.pipeline_mode<synchronous>, transform_indices = @transform_6, window_bounds = array<i64: 32, 128>}, {pipeline_mode = #tpu.pipeline_mode<synchronous>, transform_indices = @transform_7, window_bounds = array<i64: 1, 128>}, {transform_indices = @transform_8, window_bounds = array<i64: 1, 8, 128>}]} {
    %c0_i32 = arith.constant 0 : i32
    %0 = arith.cmpi eq, %arg1, %c0_i32 : i32
    %1 = arith.extui %0 : i1 to i32
    %c0_i32_0 = arith.constant 0 : i32
    %2 = arith.cmpi ne, %1, %c0_i32_0 : i32
    scf.if %2 {
      %c0_39 = arith.constant 0 : index
      %c0_40 = arith.constant 0 : index
      %c0_41 = arith.constant 0 : index
      %47 = vector.load %arg2[%c0_39, %c0_40, %c0_41] : memref<1x8x32xbf16, #tpu.memory_space<vmem>>, vector<1x8x32xbf16>
      %48 = vector.shape_cast %47 : vector<1x8x32xbf16> to vector<8x32xbf16>
      %c0_42 = arith.constant 0 : index
      %c0_43 = arith.constant 0 : index
      %49 = vector.load %arg4[%c0_42, %c0_43] : memref<32x128xbf16, #tpu.memory_space<vmem>>, vector<32x128xbf16>
      %cst_44 = arith.constant dense<0.000000e+00> : vector<8x128xf32>
      %50 = tpu.matmul %48, %49, %cst_44 {dimension_numbers = #tpu.dot_dimension_numbers<[1], [0], [0], [1], [0, 0, 1, 1], [], []>} : vector<8x32xbf16>, vector<32x128xbf16>, vector<8x128xf32> -> vector<8x128xf32>
      %c0_45 = arith.constant 0 : index
      %c0_46 = arith.constant 0 : index
      %51 = vector.load %arg5[%c0_45, %c0_46] : memref<1x128xf32, #tpu.memory_space<vmem>>, vector<1x128xf32>
      %52 = vector.broadcast %51 : vector<1x128xf32> to vector<8x128xf32>
      %53 = arith.addf %50, %52 : vector<8x128xf32>
      %54 = vector.shape_cast %53 : vector<8x128xf32> to vector<1x8x128xf32>
      %55 = arith.truncf %54 : vector<1x8x128xf32> to vector<1x8x128xbf16>
      %c0_47 = arith.constant 0 : index
      %c0_48 = arith.constant 0 : index
      %c0_49 = arith.constant 0 : index
      %56 = vector.load %arg11[%c0_47, %c0_48, %c0_49] : memref<1x8x128xbf16, #tpu.memory_space<vmem>>, vector<1x8x128xbf16>
      tpu.vector_store %arg11[%c0_47, %c0_48, %c0_49], %55 {strides = array<i32>} : memref<1x8x128xbf16, #tpu.memory_space<vmem>>, vector<1x8x128xbf16>,
      %cst_50 = arith.constant 0xFF800000 : f32
      %57 = vector.broadcast %cst_50 : f32 to vector<1x8x1xf32>
      %c0_51 = arith.constant 0 : index
      %c0_52 = arith.constant 0 : index
      %c0_53 = arith.constant 0 : index
      %58 = vector.load %arg12[%c0_51, %c0_52, %c0_53] : memref<1x8x1xf32, #tpu.memory_space<vmem>>, vector<1x8x1xf32>
      tpu.vector_store %arg12[%c0_51, %c0_52, %c0_53], %57 {strides = array<i32>} : memref<1x8x1xf32, #tpu.memory_space<vmem>>, vector<1x8x1xf32>,
      %cst_54 = arith.constant 0.000000e+00 : f32
      %59 = vector.broadcast %cst_54 : f32 to vector<1x8x1xf32>
      %c0_55 = arith.constant 0 : index
      %c0_56 = arith.constant 0 : index
      %c0_57 = arith.constant 0 : index
      %60 = vector.load %arg13[%c0_55, %c0_56, %c0_57] : memref<1x8x1xf32, #tpu.memory_space<vmem>>, vector<1x8x1xf32>
      tpu.vector_store %arg13[%c0_55, %c0_56, %c0_57], %59 {strides = array<i32>} : memref<1x8x1xf32, #tpu.memory_space<vmem>>, vector<1x8x1xf32>,
      %cst_58 = arith.constant 0.000000e+00 : f32
      %61 = vector.broadcast %cst_58 : f32 to vector<1x8x128xf32>
      %c0_59 = arith.constant 0 : index
      %c0_60 = arith.constant 0 : index
      %c0_61 = arith.constant 0 : index
      %62 = vector.load %arg14[%c0_59, %c0_60, %c0_61] : memref<1x8x128xf32, #tpu.memory_space<vmem>>, vector<1x8x128xf32>
      tpu.vector_store %arg14[%c0_59, %c0_60, %c0_61], %61 {strides = array<i32>} : memref<1x8x128xf32, #tpu.memory_space<vmem>>, vector<1x8x128xf32>,
    } else {
    }
    %c0 = arith.constant 0 : index
    %c0_1 = arith.constant 0 : index
    %c0_2 = arith.constant 0 : index
    %3 = vector.load %arg3[%c0, %c0_1, %c0_2] : memref<1x8x32xbf16, #tpu.memory_space<vmem>>, vector<1x8x32xbf16>
    %4 = vector.shape_cast %3 : vector<1x8x32xbf16> to vector<8x32xbf16>
    %c0_3 = arith.constant 0 : index
    %c0_4 = arith.constant 0 : index
    %5 = vector.load %arg6[%c0_3, %c0_4] : memref<32x128xbf16, #tpu.memory_space<vmem>>, vector<32x128xbf16>
    %cst = arith.constant dense<0.000000e+00> : vector<8x128xf32>
    %6 = tpu.matmul %4, %5, %cst {dimension_numbers = #tpu.dot_dimension_numbers<[1], [0], [0], [1], [0, 0, 1, 1], [], []>} : vector<8x32xbf16>, vector<32x128xbf16>, vector<8x128xf32> -> vector<8x128xf32>
    %c0_5 = arith.constant 0 : index
    %c0_6 = arith.constant 0 : index
    %7 = vector.load %arg7[%c0_5, %c0_6] : memref<1x128xf32, #tpu.memory_space<vmem>>, vector<1x128xf32>
    %8 = vector.broadcast %7 : vector<1x128xf32> to vector<8x128xf32>
    %9 = arith.addf %6, %8 : vector<8x128xf32>
    %c0_7 = arith.constant 0 : index
    %c0_8 = arith.constant 0 : index
    %10 = vector.load %arg8[%c0_7, %c0_8] : memref<32x128xbf16, #tpu.memory_space<vmem>>, vector<32x128xbf16>
    %cst_9 = arith.constant dense<0.000000e+00> : vector<8x128xf32>
    %11 = tpu.matmul %4, %10, %cst_9 {dimension_numbers = #tpu.dot_dimension_numbers<[1], [0], [0], [1], [0, 0, 1, 1], [], []>} : vector<8x32xbf16>, vector<32x128xbf16>, vector<8x128xf32> -> vector<8x128xf32>
    %c0_10 = arith.constant 0 : index
    %c0_11 = arith.constant 0 : index
    %12 = vector.load %arg9[%c0_10, %c0_11] : memref<1x128xf32, #tpu.memory_space<vmem>>, vector<1x128xf32>
    %13 = vector.broadcast %12 : vector<1x128xf32> to vector<8x128xf32>
    %14 = arith.addf %11, %13 : vector<8x128xf32>
    %15 = vector.shape_cast %9 : vector<8x128xf32> to vector<1x8x128xf32>
    %16 = arith.truncf %15 : vector<1x8x128xf32> to vector<1x8x128xbf16>
    %17 = vector.shape_cast %14 : vector<8x128xf32> to vector<1x8x128xf32>
    %18 = arith.truncf %17 : vector<1x8x128xf32> to vector<1x8x128xbf16>
    %c0_12 = arith.constant 0 : index
    %c0_13 = arith.constant 0 : index
    %c0_14 = arith.constant 0 : index
    %19 = vector.load %arg11[%c0_12, %c0_13, %c0_14] : memref<1x8x128xbf16, #tpu.memory_space<vmem>>, vector<1x8x128xbf16>
    "tpu.trace_start"() <{level = 10 : i32, message = "bqd,bkd->bqk"}> : () -> ()
    %cst_15 = arith.constant dense<0.000000e+00> : vector<1x8x8xf32>
    %20 = tpu.matmul %19, %16, %cst_15 {dimension_numbers = #tpu.dot_dimension_numbers<[2], [2], [1], [1], [0, 0, 0, 1, 1, 1], [0], [0]>} : vector<1x8x128xbf16>, vector<1x8x128xbf16>, vector<1x8x8xf32> -> vector<1x8x8xf32>
    "tpu.trace_stop"() : () -> ()
    %c0_16 = arith.constant 0 : index
    %c0_17 = arith.constant 0 : index
    %c0_18 = arith.constant 0 : index
    %21 = vector.load %arg12[%c0_16, %c0_17, %c0_18] : memref<1x8x1xf32, #tpu.memory_space<vmem>>, vector<1x8x1xf32>
    %cst_19 = arith.constant dense<0xFF800000> : vector<1x8xf32>
    %22 = vector.multi_reduction <maximumf>, %20, %cst_19 [2] : vector<1x8x8xf32> to vector<1x8xf32>
    %23 = vector.shape_cast %22 : vector<1x8xf32> to vector<1x8x1xf32>
    %24 = arith.maximumf %21, %23 : vector<1x8x1xf32>
    %25 = arith.subf %21, %24 : vector<1x8x1xf32>
    %26 = math.exp %25 : vector<1x8x1xf32>
    %27 = vector.broadcast %24 : vector<1x8x1xf32> to vector<1x8x8xf32>
    %28 = arith.subf %20, %27 : vector<1x8x8xf32>
    %29 = math.exp %28 : vector<1x8x8xf32>
    %c0_20 = arith.constant 0 : index
    %c0_21 = arith.constant 0 : index
    %c0_22 = arith.constant 0 : index
    %30 = vector.load %arg13[%c0_20, %c0_21, %c0_22] : memref<1x8x1xf32, #tpu.memory_space<vmem>>, vector<1x8x1xf32>
    %31 = arith.mulf %26, %30 : vector<1x8x1xf32>
    %cst_23 = arith.constant dense<0.000000e+00> : vector<1x8xf32>
    %32 = vector.multi_reduction <add>, %29, %cst_23 [2] : vector<1x8x8xf32> to vector<1x8xf32>
    %33 = vector.shape_cast %32 : vector<1x8xf32> to vector<1x8x1xf32>
    %34 = arith.addf %31, %33 : vector<1x8x1xf32>
    %c0_24 = arith.constant 0 : index
    %c0_25 = arith.constant 0 : index
    %c0_26 = arith.constant 0 : index
    %35 = vector.load %arg13[%c0_24, %c0_25, %c0_26] : memref<1x8x1xf32, #tpu.memory_space<vmem>>, vector<1x8x1xf32>
    tpu.vector_store %arg13[%c0_24, %c0_25, %c0_26], %34 {strides = array<i32>} : memref<1x8x1xf32, #tpu.memory_space<vmem>>, vector<1x8x1xf32>,
    %c0_27 = arith.constant 0 : index
    %c0_28 = arith.constant 0 : index
    %c0_29 = arith.constant 0 : index
    %36 = vector.load %arg14[%c0_27, %c0_28, %c0_29] : memref<1x8x128xf32, #tpu.memory_space<vmem>>, vector<1x8x128xf32>
    %37 = vector.broadcast %26 : vector<1x8x1xf32> to vector<1x8x128xf32>
    %38 = arith.mulf %37, %36 : vector<1x8x128xf32>
    %39 = arith.truncf %29 : vector<1x8x8xf32> to vector<1x8x8xbf16>
    "tpu.trace_start"() <{level = 10 : i32, message = "bqk,bkd->bqd"}> : () -> ()
    %cst_30 = arith.constant dense<0.000000e+00> : vector<1x8x128xf32>
    %40 = tpu.matmul %39, %18, %cst_30 {dimension_numbers = #tpu.dot_dimension_numbers<[2], [1], [1], [2], [0, 0, 0, 1, 1, 2], [0], [0]>} : vector<1x8x8xbf16>, vector<1x8x128xbf16>, vector<1x8x128xf32> -> vector<1x8x128xf32>
    "tpu.trace_stop"() : () -> ()
    %41 = arith.addf %38, %40 : vector<1x8x128xf32>
    %c0_31 = arith.constant 0 : index
    %c0_32 = arith.constant 0 : index
    %c0_33 = arith.constant 0 : index
    %42 = vector.load %arg14[%c0_31, %c0_32, %c0_33] : memref<1x8x128xf32, #tpu.memory_space<vmem>>, vector<1x8x128xf32>
    tpu.vector_store %arg14[%c0_31, %c0_32, %c0_33], %41 {strides = array<i32>} : memref<1x8x128xf32, #tpu.memory_space<vmem>>, vector<1x8x128xf32>,
    %c0_34 = arith.constant 0 : index
    %c0_35 = arith.constant 0 : index
    %c0_36 = arith.constant 0 : index
    %43 = vector.load %arg12[%c0_34, %c0_35, %c0_36] : memref<1x8x1xf32, #tpu.memory_space<vmem>>, vector<1x8x1xf32>
    tpu.vector_store %arg12[%c0_34, %c0_35, %c0_36], %24 {strides = array<i32>} : memref<1x8x1xf32, #tpu.memory_space<vmem>>, vector<1x8x1xf32>,
    %c0_i32_37 = arith.constant 0 : i32
    %44 = arith.cmpi eq, %arg1, %c0_i32_37 : i32
    %45 = arith.extui %44 : i1 to i32
    %c0_i32_38 = arith.constant 0 : i32
    %46 = arith.cmpi ne, %45, %c0_i32_38 : i32
    scf.if %46 {
      %c0_39 = arith.constant 0 : index
      %c0_40 = arith.constant 0 : index
      %c0_41 = arith.constant 0 : index
      %47 = vector.load %arg14[%c0_39, %c0_40, %c0_41] : memref<1x8x128xf32, #tpu.memory_space<vmem>>, vector<1x8x128xf32>
      %c0_42 = arith.constant 0 : index
      %c0_43 = arith.constant 0 : index
      %c0_44 = arith.constant 0 : index
      %48 = vector.load %arg13[%c0_42, %c0_43, %c0_44] : memref<1x8x1xf32, #tpu.memory_space<vmem>>, vector<1x8x1xf32>
      %49 = vector.broadcast %48 : vector<1x8x1xf32> to vector<1x8x128xf32>
      %50 = arith.divf %47, %49 : vector<1x8x128xf32>
      %c0_45 = arith.constant 0 : index
      %c0_46 = arith.constant 0 : index
      %c0_47 = arith.constant 0 : index
      %51 = vector.load %arg10[%c0_45, %c0_46, %c0_47] : memref<1x8x128xf32, #tpu.memory_space<vmem>>, vector<1x8x128xf32>
      tpu.vector_store %arg10[%c0_45, %c0_46, %c0_47], %50 {strides = array<i32>} : memref<1x8x128xf32, #tpu.memory_space<vmem>>, vector<1x8x128xf32>,
    } else {
    }
    return
  }
  func.func @transform_0(%arg0: i32, %arg1: i32) -> (i32, i32, i32) {
    %c0_i32 = arith.constant 0 : i32
    %c0_i32_0 = arith.constant 0 : i32
    %c0_i32_1 = arith.constant 0 : i32
    return %arg0, %c0_i32, %c0_i32_0 : i32, i32, i32
  }
  func.func @transform_1(%arg0: i32, %arg1: i32) -> (i32, i32, i32) {
    %c0_i32 = arith.constant 0 : i32
    %c0_i32_0 = arith.constant 0 : i32
    return %arg0, %arg1, %c0_i32 : i32, i32, i32
  }
  func.func @transform_2(%arg0: i32, %arg1: i32) -> (i32, i32) {
    %c0_i32 = arith.constant 0 : i32
    %c0_i32_0 = arith.constant 0 : i32
    %c0_i32_1 = arith.constant 0 : i32
    return %c0_i32, %c0_i32_0 : i32, i32
  }
  func.func @transform_3(%arg0: i32, %arg1: i32) -> (i32, i32) {
    %c0_i32 = arith.constant 0 : i32
    %c0_i32_0 = arith.constant 0 : i32
    %c0_i32_1 = arith.constant 0 : i32
    return %c0_i32, %c0_i32_0 : i32, i32
  }
  func.func @transform_4(%arg0: i32, %arg1: i32) -> (i32, i32) {
    %c0_i32 = arith.constant 0 : i32
    %c0_i32_0 = arith.constant 0 : i32
    %c0_i32_1 = arith.constant 0 : i32
    return %c0_i32, %c0_i32_0 : i32, i32
  }
  func.func @transform_5(%arg0: i32, %arg1: i32) -> (i32, i32) {
    %c0_i32 = arith.constant 0 : i32
    %c0_i32_0 = arith.constant 0 : i32
    %c0_i32_1 = arith.constant 0 : i32
    return %c0_i32, %c0_i32_0 : i32, i32
  }
  func.func @transform_6(%arg0: i32, %arg1: i32) -> (i32, i32) {
    %c0_i32 = arith.constant 0 : i32
    %c0_i32_0 = arith.constant 0 : i32
    %c0_i32_1 = arith.constant 0 : i32
    return %c0_i32, %c0_i32_0 : i32, i32
  }
  func.func @transform_7(%arg0: i32, %arg1: i32) -> (i32, i32) {
    %c0_i32 = arith.constant 0 : i32
    %c0_i32_0 = arith.constant 0 : i32
    %c0_i32_1 = arith.constant 0 : i32
    return %c0_i32, %c0_i32_0 : i32, i32
  }
  func.func @transform_8(%arg0: i32, %arg1: i32) -> (i32, i32, i32) {
    %c0_i32 = arith.constant 0 : i32
    %c0_i32_0 = arith.constant 0 : i32
    %c0_i32_1 = arith.constant 0 : i32
    return %arg0, %c0_i32, %c0_i32_0 : i32, i32, i32
  }
}

</mosaic_0001>

<bundles_post_ra>
// kernel: tpu_custom_call.1
= control target key start
LH: loop header
LB: loop body
LE: loop exit
PB: predicated region body
PF: predicated region fallthrough
CT: control target
= control target key end

     0   :  { %s1452_s0 = inlined_call_operand.hbm [shape: bf16[2,8,32], index: 0, kind: input, shape index: {}]   ;;  %s1453_s1 = inlined_call_operand.hbm [shape: bf16[2,8,32], index: 1, kind: input, shape index: {}]   ;;  %s1454_s2 = inlined_call_operand.hbm [shape: bf16[32,128], index: 2, kind: input, shape index: {}]   ;;  %s1455_s3 = inlined_call_operand.vmem [shape: f32[1,128], index: 3, kind: input, shape index: {}]   ;;  %s1456_s4 = inlined_call_operand.hbm [shape: bf16[32,128], index: 4, kind: input, shape index: {}]   ;;  %s1457_s5 = inlined_call_operand.vmem [shape: f32[1,128], index: 5, kind: input, shape index: {}]   ;;  %s1458_s6 = inlined_call_operand.hbm [shape: bf16[32,128], index: 6, kind: input, shape index: {}]   ;;  %s1459_s7 = inlined_call_operand.vmem [shape: f32[1,128], index: 7, kind: input, shape index: {}]   ;;  %s1460_s8 = inlined_call_operand.hbm [shape: f32[2,8,128], index: 8, kind: output, shape index: {}]  }
   0x1   :  { %1466 = sst [smem:[#allocation27_spill]] %s1454_s2 }
   0x2   :  { %1467 = sst [smem:[#allocation28_spill]] %s1456_s4 }
   0x3   :  { %1468 = sst [smem:[#allocation29_spill]] %s1458_s6 }
   0x4   :  { %13 = vsyncpa [#allocation7], 0 }
   0x5   :  { %15 = vsyncpa [#allocation7 + $0x1], 0 }
   0x6   :  { %16 = vsyncpa [#allocation10], 0 }
   0x7   :  { %18 = vsyncpa [#allocation10 + $0x1], 0 }
   0x8   :  { %19 = vsyncpa [#allocation13], 0 }
   0x9   :  { %20 = vsyncpa [#allocation8], 0 }
   0xa   :  { %22 = vsyncpa [#allocation8 + $0x1], 0  ;;  %s1260_s27 = smov 0   ;;  %s1262_s28 = smov 0  }
   0xb   :  { %s1264_s29 = smov 0   ;;  %s1266_s30 = smov 0  }
   0xc   :  { %s1268_s9 = smov 0   ;;  %s1270_s10 = smov 0  }
   0xd LB: > { %1469 = sst [smem:[#allocation21_spill]] %s1185_s27  ;;  %s1291_s11 = sadd.s32 4294967295, %s1205_s10   ;;  %s1205_s10 = sphi %s1270_s10, %s28_s10   ;;  %s1201_s9 = sphi %s1268_s9, %s1489_s9   ;;  %s1197_s30 = sphi %s1266_s30, %s1488_s30   ;;  %s1193_s29 = sphi %s1264_s29, %s1487_s29   ;;  %s1189_s28 = sphi %s1262_s28, %s1491_s28   ;;  %s1185_s27 = sphi %s1260_s27, %s1490_s27  }
   0xe   : > { %1470 = sst [smem:[#allocation22_spill]] %s1193_s29  ;;  %p792_p0 = scmp.ge.s32.totalorder %s1205_s10, 1 }
   0xf   : > { %1471 = sst [smem:[#allocation23_spill]] %s1201_s9  ;;  %p61_p1 = scmp.eq.s32.totalorder %s1291_s11, 0 }
  0x10   : > { %p251_p2 = scmp.lt.s32.totalorder %s1205_s10, 3  ;;  %s1472_s2 = sld [smem:[#allocation27_spill]] }
  0x11   : > { %s1207_s16 = smov [#allocation11]   ;;  %p796_p6 = scmp.ge.s32.totalorder %s1205_s10, 2 }
  0x12   : > { %p1299_p3 = pnand %p792_p0, %p251_p2  ;;  %s264_s17 = sshll.u32 %s1207_s16, 4  ;;  %s265_s17 = int_to_ptr.vmem [resolvable:$true] %s264_s17 }
  0x13   : > { %s1475_s4 = sld [smem:[#allocation28_spill]]  ;;  %s1208_s22 = smov 64  }
  0x14   : > { %p864_p4 = pneg %p1299_p3  ;;  %s1209_s23 = smov 4  }
  0x15   : > { %s1210_s24 = smov [#allocation12]   ;;  %s1476_s6 = sld [smem:[#allocation29_spill]] }
  0x16   : > { %s262_s14 = sshll.u32 %s1472_s2, 4  ;;  %p1307_p5 = pnand %p864_p4, %p61_p1  ;;  %s263_s14 = int_to_ptr.hbm [resolvable:$true] %s262_s14 }
  0x17   : > { %s281_s25 = sshll.u32 %s1210_s24, 4  ;;  %s1211_s16 = smov [#allocation14]   ;;  %s282_s25 = int_to_ptr.vmem [resolvable:$true] %s281_s25 }
  0x18   : > { %867 = dma.hbm_to_vmem [thread:$0]  (!%p1307_p5), %s263_s14, 256, %s265_s17, [#allocation10], %s1208_s22, %s1208_s22, %s1209_s23  }
  0x19   : > { %s279_s21 = sshll.u32 %s1475_s4, 4  ;;  %s298_s19 = sshll.u32 %s1211_s16, 4  ;;  %s280_s21 = int_to_ptr.hbm [resolvable:$true] %s279_s21  ;;  %s299_s19 = int_to_ptr.vmem [resolvable:$true] %s298_s19 }
  0x1a   : > { %870 = dma.hbm_to_vmem [thread:$0]  (!%p1307_p5), %s280_s21, 256, %s282_s25, [#allocation13], %s1208_s22, %s1208_s22, %s1209_s23  }
  0x1b   : > { %s296_s13 = sshll.u32 %s1476_s6, 4  ;;  %s791_s14 = sadd.s32 4294967294, %s1205_s10   ;;  %s297_s13 = int_to_ptr.hbm [resolvable:$true] %s296_s13 }
  0x1c   : > { %873 = dma.hbm_to_vmem [thread:$0]  (!%p1307_p5), %s297_s13, 256, %s299_s19, [#allocation13], %s1208_s22, %s1208_s22, %s1209_s23  }
  0x1d   : > { %s40_s17 = sadd.s32 1, %s1201_s9  ;;  %s47_s20 = sadd.s32 1, %s1193_s29 }
  0x1e   : > { %p42_p7 = scmp.ge.s32.totalorder %s40_s17, 2  ;;  %p54_p8 = scmp.ne.s32.totalorder %s1193_s29, %s1189_s28 }
  0x1f   : > { %p55_p9 = scmp.eq.s32.totalorder %s1205_s10, 0  ;;  %p60_p10 = scmp.ne.s32.totalorder %s1189_s28, %s1185_s27 }
  0x20   : > { %s1493_s17 = smov (%p42_p7, %s40_s17), 0  ;;  %p238_p13 = scmp.eq.s32.totalorder %s1291_s11, 1 }
  0x21   : > { %1477 = sst [smem:[#allocation24_spill]] %s1493_s17  ;;  %p1334_p11 = por %p55_p9, %p54_p8 }
  0x22   : > { %p1340_p12 = por %p61_p1, %p60_p10  ;;  %s44_s22 = ssub.s32 %s1201_s9, %s1493_s17 }
  0x23   : > { %p45_p0 = scmp.eq.s32.totalorder %s44_s22, 0  ;;  %p244_p2 = scmp.eq.s32.totalorder %s791_s14, 1 }
  0x24   : > { %p1347_p4 = por %p238_p13, %p54_p8  ;;  %p888_p5 = scmp.lt.s32.totalorder %s1205_s10, 2 }
  0x25   : > { %s1353_s24 = scalar_select %p45_p0, %s1193_s29, %s47_s20  }
  0x26   : > { %p1355_p7 = por %p244_p2, %p60_p10  ;;  %s315_s26 = sand.u32 1, %s1193_s29  }
  0x27   : > { %1481 = sst [smem:[#allocation25_spill]] %s1353_s24  ;;  %s797_s12 = sshll.u32 %s315_s26, 2 }
  0x28   : > { %s1482_s25 = scalar_select %p1355_p7, 1, 0 }
  0x29   : > { %s798_s13 = sshll.u32 %s1201_s9, 2  ;;  %s319_s14 = scalar_lea.vmem [#allocation6], %s797_s12 }
  0x2a   : > { %1483 = sst [smem:[#allocation26_spill]] %s1482_s25  ;;  %s323_s22 = scalar_lea.hbm %s1452_s0, %s798_s13 }
  0x2b   : > { %s327_s2 = sshll.u32 %s319_s14, 4  ;;  %s325_s4 = sshll.u32 %s323_s22, 4  ;;  %s328_s2 = int_to_ptr.vmem [resolvable:$true] %s327_s2  ;;  %s326_s4 = int_to_ptr.hbm [resolvable:$true] %s325_s4 }
  0x2c   : > { %p875_p8 = pnand %p888_p5, %p1334_p11  ;;  %s343_s17 = scalar_lea.hbm %s1453_s1, %s798_s13 }
  0x2d   : > { %s334_s24 = sand.u32 1, %s1205_s10   ;;  %s316_s25 = scalar_lea.sflag [#allocation7], %s315_s26 }
  0x2e   : > { %877 = dma.hbm_to_vmem [thread:$0]  (!%p875_p8), %s326_s4, 64, %s328_s2, %s316_s25  }
  0x2f   : > { %s345_s29 = sshll.u32 %s343_s17, 4  ;;  %s338_s9 = scalar_lea.vmem [#allocation9], %s797_s12  ;;  %s346_s29 = int_to_ptr.hbm [resolvable:$true] %s345_s29 }
  0x30   : > { %s347_s27 = sshll.u32 %s338_s9, 4  ;;  %s335_s16 = scalar_lea.sflag [#allocation10], %s334_s24  ;;  %s348_s27 = int_to_ptr.vmem [resolvable:$true] %s347_s27 }
  0x31   : > { %880 = dma.hbm_to_vmem [thread:$0]  (!%p875_p8), %s346_s29, 64, %s348_s27, %s335_s16  }
  0x32   : > { %356 = sbr.rel (%p1299_p3) target bundleno = 850 (0x352), region = 52  ;;  %s1373_s21 = sand.u32 (!%p1299_p3), 1, %s1189_s28  }
  0x33   : > { %s802_s6 = sshll.u32 (!%p1299_p3), %s1373_s21, 2  ;;  %s359_s13 = scalar_lea.sflag (!%p1299_p3), [#allocation7], %s1373_s21 }
  0x34   : > { %s362_s26 = scalar_lea.vmem (!%p1299_p3), [#allocation6], %s802_s6 }
  0x37   : > { %1164 = dma.done.wait (%p1340_p12), %s359_s13, 64  }
  0x38   : > { %1166 = vsyncadd (%p1340_p12), %s359_s13, 4294967232  ;;  %s368_s2 = sand.u32 1, %s1291_s11   ;;  %s372_s27 = scalar_lea.vmem [#allocation9], %s802_s6 }
  0x39   : > { %s369_s4 = scalar_lea.sflag [#allocation10], %s368_s2 }
  0x3a   : > { %1168 = dma.done.wait (%p1340_p12), %s369_s4, 64  }
  0x3b   : > { %1170 = vsyncadd (%p1340_p12), %s369_s4, 4294967232 }
  0x3c   : > { %1172 = dma.done.wait (%p61_p1), [#allocation10], 256  }
  0x3d   : > { %1174 = vsyncadd (%p61_p1), [#allocation10], 4294967040 }
  0x3e   : > { %1176 = dma.done.wait (%p61_p1), [#allocation13], 512  }
  0x3f   : > { %1178 = vsyncadd (%p61_p1), [#allocation13], 4294966784  ;;  %v841_v0 = vld [vmem:[#allocation11 + $0x8] sm:$0xff]  ;;  %v843_v1 = vld [vmem:[#allocation12 + $0x8] sm:$0xff]  ;;  %vm452_vm0 = vcmask 261120   ;;  %vm471_vm1 = vcmask 7168  }
  0x40   : > { %v840_v2 = vld [vmem:[#allocation11] sm:$0xff]  ;;  %462 = vmatpush.bf16.msra.mxu0 %v841_v0  ;;  %506 = vmatpush.bf16.msra.mxu1 %v843_v1  ;;  %v842_v3 = vld [vmem:[#allocation12] sm:$0xff]  ;;  %v475_v5 = vld [vmem:[%s372_s27] sm:$0xf]  ;;  %v1212_v18 = vmov -inf   ;;  %vm563_vm2 = vcmask 64512  }
  0x41   : > { %v431_v4 = vld [vmem:[%s362_s26] sm:$0xf]  ;;  %v952_v6 = vld [vmem:[%s1455_s3] ss:$0 sm:$0xff]  ;;  %v845_v17 = vld [vmem:[#allocation14 + $0x8] sm:$0xff]  ;;  %472 = vst.msk [vmem:[#allocation3] sm:$0xff] %vm471_vm1, %v1212_v18 }
  0x42   : > { %v953_v7 = vld [vmem:[%s1457_s5] ss:$0 sm:$0xff]  ;;  %539 = vmatpush.bf16.msra.mxu2 %v845_v17  ;;  %v844_v19 = vld [vmem:[#allocation14] sm:$0xff]  ;;  %v1213_v23 = vmov 0   ;;  %v1214_v24 = vmov 0.0   ;;  %vm598_vm3 = vcmask 1043456  }
  0x43   : > { %949 = vset.pattern.permute.xlu0 %v1213_v23  ;;  %951 = vset.pattern.permute.xlu2 %v1213_v23  ;;  %473 = vst.msk [vmem:[#allocation4] sm:$0xff] %vm471_vm1, %v1214_v24  ;;  %v954_v31 = vld [vmem:[%s1459_s7] ss:$0 sm:$0xff]  ;;  %s807_s24 = sshll.u32 %s1373_s21, 3  ;;  %s837_s25 = sshll.u32 %s1197_s30, 3 }
  0x44   : > { %463 = vmatpush.bf16.msra.mxu0 %v840_v2  ;;  %507 = vmatpush.bf16.msra.mxu1 %v842_v3  ;;  %s655_s22 = scalar_lea.hbm %s1460_s8, %s837_s25  ;;  %s425_s14 = scalar_lea.vmem [#allocation15], %s807_s24 }
  0x45   : > { %950 = vset.pattern.permute.xlu1 %v1213_v23  ;;  %s657_s20 = sshll.u32 %s425_s14, 4  ;;  %s659_s30 = sshll.u32 %s655_s22, 4  ;;  %s658_s20 = int_to_ptr.vmem [resolvable:$true] %s657_s20  ;;  %s660_s30 = int_to_ptr.hbm [resolvable:$true] %s659_s30 }
  0x46   : > { %540 = vmatpush.bf16.msra.mxu2 %v844_v19  ;;  %s645_s16 = scalar_lea.sflag [#allocation8], %s1373_s21  ;;  %s1125_s6 = sshra.s32 %s660_s30, 4  ;;  %s1126_s6 = int_to_ptr.hbm [resolvable:$true] %s1125_s6 }
  0x47   : > { %816 = vmatmul.msk.bf16.vlgmr.msra.gmra.mxu0 %vm452_vm0, %v431_v4  ;;  %825 = vmatmul.msk.bf16.vlgmr.msra.gmra.mxu1 %vm452_vm0, %v475_v5  ;;  %s1127_s13 = scalar_lea.hbm %s1126_s6, 8  ;;  %s1131_s4 = scalar_lea.hbm %s1460_s8, 16 }
  0x48   : > { %v562_v25 = vld [vmem:[#allocation3] sm:$0xff]  ;;  %p1128_p1 = scmp.ne.s32.totalorder %s1126_s6, %s1127_s13  ;;  %p1132_p10 = scmp.lt.s32.totalorder %s1126_s6, %s1460_s8 }
  0x49   : > { %834 = vmatmul.msk.bf16.vlgmr.msra.gmra.mxu2 %vm452_vm0, %v475_v5  ;;  %p1133_p11 = scmp.lt.s32.totalorder %s1131_s4, %s1127_s13 }
  0x4a   : > { %v579_v43 = vld [vmem:[#allocation4] sm:$0xff]  ;;  %p1129_p3 = pnand %p1128_p1, %p1347_p4 }
  0x4b   : > { %p1134_p12 = por %p1133_p11, %p1132_p10 }
  0x4c   : > { %p1130_p9 = pneg %p1129_p3 }
  0x4e   : > { %p1135_p13 = pnand %p1134_p12, %p1130_p9 }
  0xc4   : > { %v465_v8 = vpop.f32.mrf.mxu0  ;;  %v509_v9 = vpop.f32.mrf.mxu1 }
  0xc5   : > { %v466_v10 = vadd.f32 %v952_v6, %v465_v8  ;;  %v510_v11 = vadd.f32 %v953_v7, %v509_v9 }
  0xc7   : > { %v469_v12 = vpack.c.bf16 %v466_v10, %v466_v10  ;;  %v546_v13 = vpack.c.bf16 %v510_v11, %v510_v11 }
  0xc9   : > { %470 = vst [vmem:[#allocation2] sm:$0xf] %v469_v12  ;;  %556 = vmatpush.bf16.xpose.msra.mxu3 %v546_v13 }
  0xcc   : > { %v467_v14 = vpop.f32.mrf.mxu0  ;;  %v511_v15 = vpop.f32.mrf.mxu1 }
  0xcd   : > { %v542_v32 = vpop.f32.mrf.mxu2 }
  0xce   : > { %v543_v33 = vadd.f32 %v954_v31, %v542_v32 }
  0xd0   : > { %v548_v16 = vld [vmem:[#allocation2] sm:$0xf]  ;;  %v547_v34 = vpack.c.bf16 %v543_v33, %v543_v33 }
  0xd1   : > { %557 = vmatmul.bf16.vlgmr.msra.gmra.mxu3 %v548_v16 }
  0xd2   : > { %v600_v35 = vsel %vm598_vm3, %v547_v34, 0 }
  0xd3   : > { %609 = vmatpush.bf16.msrb.mxu0 %v600_v35 }
  0xd5   : > { %v544_v36 = vpop.f32.mrf.mxu2 }
 0x154   : > { %v558_v20 = vpop.f32.mrf.mxu3 }
 0x155   : > { %v564_v21 = vsel %vm563_vm2, %v558_v20, -inf }
 0x156   : > { %565 = vmax.xlane.f32.xlu0 %v564_v21 }
 0x15c   : > { %v560_v22 = vpop.f32.mrf.mxu3 }
 0x1c9   : > { %v566_v26 = vpop.xlane.xlu0 %565 }
 0x1ca   : > { %v567_v27 = vmax.f32 %v562_v25, %v566_v26 }
 0x1cc   : > { %v568_v28 = vsub.f32 %v562_v25, %v567_v27  ;;  %617 = vst.msk [vmem:[#allocation3] sm:$0xff] %vm471_vm1, %v567_v27  ;;  %573 = vperm.xlu0 %949, %v567_v27  }
 0x1ce   : > { %v569_v29 = vmul.f32 1.442695, %v568_v28 }
 0x1d0   : > { %955 = vpow2.f32 %v569_v29 }
 0x1d6   : > { %v956_v30 = vpop.eup %955 }
 0x1d7   : > { %590 = vperm.xlu2 %951, %v956_v30   ;;  %v580_v44 = vmul.f32 %v956_v30, %v579_v43 }
 0x231   : > { %v591_v54 = vpop.permute.xlu2 %590 }
 0x232   : > { %v593_v58 = vmul.f32 0.0, %v591_v54 }
 0x23e   : > { %v574_v37 = vpop.permute.xlu0 %573 }
 0x23f   : > { %v576_v38 = vsub.f32 %v558_v20, %v574_v37 }
 0x241   : > { %v577_v39 = vmul.f32 1.442695, %v576_v38 }
 0x243   : > { %957 = vpow2.f32 %v577_v39 }
 0x249   : > { %v958_v40 = vpop.eup %957 }
 0x24a   : > { %v581_v41 = vsel %vm563_vm2, %v958_v40, 0.0  ;;  %v594_v42 = vpack.c.bf16 %v958_v40, %v958_v40 }
 0x24b   : > { %582 = vadd.xlane.f32.xlu1 %v581_v41 }
 0x24c   : > { %835 = vmatmul.msk.bf16.vlgmr.msrb.gmra.mxu0 %vm563_vm2, %v594_v42 }
 0x2be   : > { %v583_v45 = vpop.xlane.xlu1 %582 }
 0x2bf   : > { %v584_v46 = vadd.f32 %v583_v45, %v580_v44 }
 0x2c1   : > { %586 = vst.msk [vmem:[#allocation4] sm:$0xff] %vm471_vm1, %v584_v46 }
 0x2c8   : > { %v622_v47 = vld [vmem:[#allocation4] sm:$0xff] }
 0x2c9   : > { %v611_v48 = vpop.f32.mrf.mxu0  ;;  %625 = vperm.xlu1 %950, %v622_v47  }
 0x2ca   : > { %v615_v61 = vadd.f32 %v611_v48, %v593_v58 }
 0x2d1   : > { %v613_v49 = vpop.f32.mrf.mxu0 }
 0x33b   : > { %v626_v50 = vpop.permute.xlu1 %625 }
 0x33c   : > { %959 = vrcp.f32 %v626_v50  ;;  %v639_v55 = vand.u32 2147483648, %v626_v50  ;;  %v637_v57 = vand.u32 2147483647, %v626_v50  ;;  %vm633_vm5 = vweird.f32 %v626_v50 }
 0x33e   : > { %v640_v60 = vor.u32 1.1754944e-38, %v639_v55  ;;  %vm638_vm7 = vcmp.eq.f32.partialorder %v637_v57, 8.507059e+37 }
 0x342   : > { %v960_v51 = vpop.eup %959 }
 0x343   : > { %v629_v52 = vmul.f32 %v960_v51, %v626_v50  ;;  %vm634_vm4 = vweird.f32 %v960_v51 }
 0x344   : > { %vm635_vm6 = vmor %vm633_vm5, %vm634_vm4 }
 0x345   : > { %v630_v53 = vsub.f32 1.0, %v629_v52 }
 0x347   : > { %v631_v56 = vmul.f32 %v960_v51, %v630_v53 }
 0x349   : > { %v632_v59 = vadd.f32 %v960_v51, %v631_v56 }
 0x34b   : > { %v636_v62 = vsel %vm635_vm6, %v960_v51, %v632_v59 }
 0x34c   : > { %v641_v63 = vsel %vm638_vm7, %v640_v60, %v636_v62 }
 0x34d   : > { %v642_v0 = vmul.f32 %v641_v63, %v615_v61 }
 0x34f   : > { %643 = vst [vmem:[%s425_s14] sm:$0xff] %v642_v0 }
 0x350   : > { %1138 = shalt.err (!%p1135_p13)
}
 0x351   : > { %862 = dma.vmem_to_hbm [thread:$0]  (%p1347_p4), %s658_s20, 128, %s660_s30, %s645_s16  }
 0x352 PF: > { %s1484_s21 = sld [smem:[#allocation21_spill]]  ;;  %p882_p0 = pnand %p796_p6, %p1355_p7 }
 0x354   : > { %p883_p2 = pneg %p882_p0 }
 0x358   : > { %s671_s11 = sand.u32 1, %s1484_s21  }
 0x359   : > { %s672_s15 = scalar_lea.sflag [#allocation8], %s671_s11 }
 0x35a   : > { %1180 = dma.done.wait (%p883_p2), %s672_s15, 128  }
 0x35b   : > { %1182 = vsyncadd (%p883_p2), %s672_s15, 4294967168  ;;  %s28_s10 = sadd.s32 1, %s1205_s10   ;;  %s1486_s17 = sld [smem:[#allocation22_spill]] }
 0x35c   : > { %p25_p5 = scmp.ge.s32.totalorder %s28_s10, 4   ;;  %s1487_s29 = sld [smem:[#allocation25_spill]] }
 0x35d   : > { %s1488_s30 = sld [smem:[#allocation23_spill]]  ;;  %s1490_s27 = smov %s1189_s28 }
 0x35e   : > { %s1489_s9 = sld [smem:[#allocation24_spill]]  ;;  %27 = sbr.rel (!%p25_p5) target bundleno = 13 (0xd), region = 130 }
 0x361   : > { %s1491_s28 = smov %s1486_s17 }
 0x363   :  { %678 = vsyncpa [#allocation7], 1 }
 0x364   :  { %680 = vsyncpa [#allocation7 + $0x1], 1 }
 0x365   :  { %681 = vsyncpa [#allocation10], 1 }
 0x366   :  { %683 = vsyncpa [#allocation10 + $0x1], 1 }
 0x367   :  { %684 = vsyncpa [#allocation13], 1 }
 0x368   :  { %685 = vsyncpa [#allocation8], 1 }
 0x369   :  { %687 = vsyncpa [#allocation8 + $0x1], 1 }

</bundles_post_ra>
